<compile_context>
chip_gen: v7x
topology: tpu7x:2x2x1
jax: 0.10.0
libtpu: 0.0.40
codegen_flags: <defaults>
</compile_context>

<pallas_src>
import jax
import jax.numpy as jnp
from jax.experimental import pallas as pl
from jax.experimental.pallas import tpu as pltpu


# ----------------------------- kernel ----------------------------------------
def fused_kernel(z_ref, w1_ref, b1_ref, w2_ref, b2_ref, o_ref):
    # (tm, 176) @ (176, 32) + (1, 32) -> relu -> (tm, 32) @ (32, 2) + (1, 2)
    h = (
        jnp.dot(z_ref[...], w1_ref[...], preferred_element_type=jnp.float32)
        + b1_ref[...]
    )
    h = jnp.maximum(h, 0.0)  # dropout(p=0) is identity
    o_ref[...] = (
        jnp.dot(h, w2_ref[...], preferred_element_type=jnp.float32)
        + b2_ref[...]
    )


# ----------------------------- wrapper ----------------------------------------
def fused_forward(z, w_eff, b_eff, w2, b2, tile_rows=512):
    """One pallas_call for the whole folded MLP. Rows tiled only if B is large."""
    B, K = z.shape
    out_dim = w2.shape[1]

    # Pick row tile: full-array block for small/odd B, 512-row tiles otherwise.
    if B <= tile_rows or (B % tile_rows) != 0:
        tm = B
    else:
        tm = tile_rows
    grid = (B // tm,)

    return pl.pallas_call(
        fused_kernel,
        out_shape=jax.ShapeDtypeStruct((B, out_dim), jnp.float32),
        grid_spec=pltpu.PrefetchScalarGridSpec(
            num_scalar_prefetch=0,
            grid=grid,
            in_specs=[
                pl.BlockSpec((tm, K), lambda i: (i, 0)),        # activations tiled by rows
                pl.BlockSpec(w_eff.shape, lambda i: (0, 0)),    # weights VMEM-resident
                pl.BlockSpec(b_eff.shape, lambda i: (0, 0)),
                pl.BlockSpec(w2.shape, lambda i: (0, 0)),
                pl.BlockSpec(b2.shape, lambda i: (0, 0)),
            ],
            out_specs=pl.BlockSpec((tm, out_dim), lambda i: (i, 0)),
        ),
        compiler_params=pltpu.CompilerParams(
            dimension_semantics=("parallel",),  # shard row grid across v7x's 2 TCs
        ),
    )(z, w_eff, b_eff, w2, b2)


def baseline_forward(x, params, B):
    """Full Baseline.forward (edge_index / edge_attr / adj are unused by the module)."""
    N = x.shape[0] // B

    w_emb, b_emb = params["w_emb"], params["b_emb"]   # (11, 4), (1, 4)
    w1, b1 = params["w1"], params["b1"]               # (4N, 32), (1, 32)
    w2, b2 = params["w2"], params["b2"]               # (32, 2), (1, 2)

    # Fold emb1 into fc1 (tiny one-time algebra, stays in plain JAX).
    w1_r = w1.reshape(N, 4, 32)                                   # (N, 4, 32)
    w_eff = jnp.einsum("fe,nej->nfj", w_emb, w1_r).reshape(N * 11, 32)
    b_eff = (b1 + jnp.einsum("e,nej->j", b_emb[0], w1_r)[None, :])  # (1, 32)

    # x is (B*N, 11) row-major -> view as (B, N*11): free reshape.
    z = x.reshape(B, N * 11)

    out = fused_forward(z, w_eff, b_eff, w2, b2)                  # (B, 2)
    reg = jnp.zeros((1,), dtype=jnp.float32)
    return out, reg


# ----------------------------- param init ------------------------------------
def init_params(key, num_nodes):
    k = jax.random.split(key, 6)
    in1 = 4 * num_nodes
    # weights stored as (in, out) = torch_weight.T ; biases as (1, out)
    return {
        "w_emb": jax.random.normal(k[0], (11, 4), jnp.float32) * 0.1,
        "b_emb": jax.random.normal(k[1], (1, 4), jnp.float32) * 0.1,
        "w1": jax.random.normal(k[2], (in1, 32), jnp.float32) * 0.1,
        "b1": jax.random.normal(k[3], (1, 32), jnp.float32) * 0.1,
        "w2": jax.random.normal(k[4], (32, 2), jnp.float32) * 0.1,
        "b2": jax.random.normal(k[5], (1, 2), jnp.float32) * 0.1,
    }


# ------------------------------- main -----------------------------------------
if __name__ == "__main__":
    key = jax.random.PRNGKey(0)
    B = 2            # batch (data.y.shape[0])
    N = 16           # num_nodes per graph
    F = 11           # input node-feature dim consumed by emb1

    kx, kp = jax.random.split(key)
    x = jax.random.normal(kx, (B * N, F), jnp.float32)   # node features
    params = init_params(kp, N)

    fwd = jax.jit(baseline_forward, static_argnames=("B",))
    out, reg = fwd(x, params, B=B)
    out = jax.block_until_ready(out)
    reg = jax.block_until_ready(reg)

    # Pure-JAX reference check (original un-fused math).
    h_ref = x @ params["w_emb"] + params["b_emb"]
    z_ref = h_ref.reshape(B, -1)
    u_ref = jnp.maximum(z_ref @ params["w1"] + params["b1"], 0.0)
    out_ref = u_ref @ params["w2"] + params["b2"]
    assert out.shape == (B, 2) and reg.shape == (1,)
    assert jnp.allclose(out, out_ref, atol=1e-5), "mismatch vs reference"

    print("KERNEL_OK")
</pallas_src>

<mosaic_0001>
module attributes {stable_mosaic.version = 11 : i64} {
  func.func @fused_kernel(%arg0: i32, %arg1: memref<2x176xf32, #tpu.memory_space<vmem>>, %arg2: memref<176x32xf32, #tpu.memory_space<vmem>>, %arg3: memref<1x32xf32, #tpu.memory_space<vmem>>, %arg4: memref<32x2xf32, #tpu.memory_space<vmem>>, %arg5: memref<1x2xf32, #tpu.memory_space<vmem>>, %arg6: memref<2x2xf32, #tpu.memory_space<vmem>>) attributes {dimension_semantics = [#tpu.dimension_semantics<parallel>], iteration_bounds = array<i64: 1>, scalar_prefetch = 0 : i64, scratch_operands = 0 : i64, tpu.core_type = #tpu.core_type<tc>, window_params = [{transform_indices = @transform_0, window_bounds = array<i64: 2, 176>}, {pipeline_mode = #tpu.pipeline_mode<synchronous>, transform_indices = @transform_1, window_bounds = array<i64: 176, 32>}, {pipeline_mode = #tpu.pipeline_mode<synchronous>, transform_indices = @transform_2, window_bounds = array<i64: 1, 32>}, {pipeline_mode = #tpu.pipeline_mode<synchronous>, transform_indices = @transform_3, window_bounds = array<i64: 32, 2>}, {pipeline_mode = #tpu.pipeline_mode<synchronous>, transform_indices = @transform_4, window_bounds = array<i64: 1, 2>}, {transform_indices = @transform_5, window_bounds = array<i64: 2, 2>}]} {
    %c0 = arith.constant 0 : index
    %c0_0 = arith.constant 0 : index
    %0 = vector.load %arg1[%c0, %c0_0] : memref<2x176xf32, #tpu.memory_space<vmem>>, vector<2x176xf32>
    %c0_1 = arith.constant 0 : index
    %c0_2 = arith.constant 0 : index
    %1 = vector.load %arg2[%c0_1, %c0_2] : memref<176x32xf32, #tpu.memory_space<vmem>>, vector<176x32xf32>
    %cst = arith.constant dense<0.000000e+00> : vector<2x32xf32>
    %2 = tpu.matmul %0, %1, %cst {dimension_numbers = #tpu.dot_dimension_numbers<[1], [0], [0], [1], [0, 0, 1, 1], [], []>} : vector<2x176xf32>, vector<176x32xf32>, vector<2x32xf32> -> vector<2x32xf32>
    %c0_3 = arith.constant 0 : index
    %c0_4 = arith.constant 0 : index
    %3 = vector.load %arg3[%c0_3, %c0_4] : memref<1x32xf32, #tpu.memory_space<vmem>>, vector<1x32xf32>
    %4 = vector.broadcast %3 : vector<1x32xf32> to vector<2x32xf32>
    %5 = arith.addf %2, %4 : vector<2x32xf32>
    %cst_5 = arith.constant 0.000000e+00 : f32
    %6 = vector.broadcast %cst_5 : f32 to vector<2x32xf32>
    %7 = arith.maximumf %5, %6 : vector<2x32xf32>
    %c0_6 = arith.constant 0 : index
    %c0_7 = arith.constant 0 : index
    %8 = vector.load %arg4[%c0_6, %c0_7] : memref<32x2xf32, #tpu.memory_space<vmem>>, vector<32x2xf32>
    %cst_8 = arith.constant dense<0.000000e+00> : vector<2x2xf32>
    %9 = tpu.matmul %7, %8, %cst_8 {dimension_numbers = #tpu.dot_dimension_numbers<[1], [0], [0], [1], [0, 0, 1, 1], [], []>} : vector<2x32xf32>, vector<32x2xf32>, vector<2x2xf32> -> vector<2x2xf32>
    %c0_9 = arith.constant 0 : index
    %c0_10 = arith.constant 0 : index
    %10 = vector.load %arg5[%c0_9, %c0_10] : memref<1x2xf32, #tpu.memory_space<vmem>>, vector<1x2xf32>
    %11 = vector.broadcast %10 : vector<1x2xf32> to vector<2x2xf32>
    %12 = arith.addf %9, %11 : vector<2x2xf32>
    %c0_11 = arith.constant 0 : index
    %c0_12 = arith.constant 0 : index
    %13 = vector.load %arg6[%c0_11, %c0_12] : memref<2x2xf32, #tpu.memory_space<vmem>>, vector<2x2xf32>
    tpu.vector_store %arg6[%c0_11, %c0_12], %12 {strides = array<i32>} : memref<2x2xf32, #tpu.memory_space<vmem>>, vector<2x2xf32>,
    return
  }
  func.func @transform_0(%arg0: i32) -> (i32, i32) {
    %c0_i32 = arith.constant 0 : i32
    %c0_i32_0 = arith.constant 0 : i32
    return %arg0, %c0_i32 : i32, i32
  }
  func.func @transform_1(%arg0: i32) -> (i32, i32) {
    %c0_i32 = arith.constant 0 : i32
    %c0_i32_0 = arith.constant 0 : i32
    %c0_i32_1 = arith.constant 0 : i32
    return %c0_i32, %c0_i32_0 : i32, i32
  }
  func.func @transform_2(%arg0: i32) -> (i32, i32) {
    %c0_i32 = arith.constant 0 : i32
    %c0_i32_0 = arith.constant 0 : i32
    %c0_i32_1 = arith.constant 0 : i32
    return %c0_i32, %c0_i32_0 : i32, i32
  }
  func.func @transform_3(%arg0: i32) -> (i32, i32) {
    %c0_i32 = arith.constant 0 : i32
    %c0_i32_0 = arith.constant 0 : i32
    %c0_i32_1 = arith.constant 0 : i32
    return %c0_i32, %c0_i32_0 : i32, i32
  }
  func.func @transform_4(%arg0: i32) -> (i32, i32) {
    %c0_i32 = arith.constant 0 : i32
    %c0_i32_0 = arith.constant 0 : i32
    %c0_i32_1 = arith.constant 0 : i32
    return %c0_i32, %c0_i32_0 : i32, i32
  }
  func.func @transform_5(%arg0: i32) -> (i32, i32) {
    %c0_i32 = arith.constant 0 : i32
    %c0_i32_0 = arith.constant 0 : i32
    return %arg0, %c0_i32 : i32, i32
  }
}

</mosaic_0001>

<bundles_post_ra>
// kernel: baseline_forward.1
= control target key start
LH: loop header
LB: loop body
LE: loop exit
PB: predicated region body
PF: predicated region fallthrough
CT: control target
= control target key end

     0   :  { %v324_v3 = vmov 0.0|0.0   ;;  %vm61_vm0 = vcmask 392192   ;;  %s457_s0 = inlined_call_operand.vmem [shape: f32[2,176], index: 0, kind: input, shape index: {}]   ;;  %s458_s1 = inlined_call_operand.vmem [shape: f32[176,32], index: 1, kind: input, shape index: {}]   ;;  %s459_s2 = inlined_call_operand.vmem [shape: f32[1,32], index: 2, kind: input, shape index: {}]   ;;  %s460_s3 = inlined_call_operand.vmem [shape: f32[32,2], index: 3, kind: input, shape index: {}]   ;;  %s461_s4 = inlined_call_operand.vmem [shape: f32[1,2], index: 4, kind: input, shape index: {}]   ;;  %s462_s5 = inlined_call_operand.hbm [shape: f32[2,2], index: 5, kind: output, shape index: {}]  }
   0x1   :  { %v22_v0 = vld [vmem:[%s458_s1] sm:$0xff]  ;;  %v23_v1 = vld [vmem:[%s458_s1 + $0x8] sm:$0xff]  ;;  %v24_v2 = vld [vmem:[%s458_s1 + $0x10] sm:$0xff]  ;;  %257 = vmatprep.subr.bf16.mxu0 %v324_v3  ;;  %290 = vmatprep.subr.bf16.mxu1 %v324_v3 }
   0x2   :  { %v258_v4 = vpack.c.bf16 %v23_v1, %v22_v0  ;;  %v25_v5 = vld [vmem:[%s458_s1 + $0x18] sm:$0xff]  ;;  %v26_v7 = vld [vmem:[%s458_s1 + $0x20] sm:$0xff]  ;;  %v27_v8 = vld [vmem:[%s458_s1 + $0x28] sm:$0xff] }
   0x3   :  { %v261_v6 = vpack.c.bf16 %v25_v5, %v24_v2  ;;  %v264_v9 = vpack.c.bf16 %v27_v8, %v26_v7  ;;  %v28_v10 = vld [vmem:[%s458_s1 + $0x30] sm:$0xff]  ;;  %v237_v11 = vld.sshfl [vmem:[%s457_s0] sm:$0x33 pattern:$0x76325410]  ;;  %v29_v13 = vld [vmem:[%s458_s1 + $0x38] sm:$0xff] }
   0x4   :  { %259 = vmatpush1.bf16.msra.mxu0 %v258_v4  ;;  %v135_v12 = vld [vmem:[%s460_s3] sm:$0xff]  ;;  %v59_v14 = vcombine.high %v237_v11, %v237_v11  ;;  %v136_v15 = vld [vmem:[%s460_s3 + $0x8] sm:$0xff] }
   0x5   :  { %260 = vmatprep.subr.bf16.mxu0 %v324_v3 }
   0x8   :  { %262 = vmatpush1.bf16.msra.mxu0 %v261_v6 }
   0x9   :  { %263 = vmatprep.subr.bf16.mxu0 %v324_v3 }
   0xa   :  { %10 = vsyncpa [#allocation3], 0  ;;  %v291_v16 = vpack.c.bf16 %v136_v15, %v135_v12  ;;  %238 = vmatprep.mubr.msk.f32.mxu0 %vm61_vm0, %v59_v14  ;;  %v267_v17 = vpack.c.bf16 %v29_v13, %v28_v10  ;;  %v30_v18 = vld [vmem:[%s458_s1 + $0x40] sm:$0xff]  ;;  %v31_v19 = vld [vmem:[%s458_s1 + $0x48] sm:$0xff]  ;;  %vm325_vm1 = vmmov 0   ;;  %v326_v42 = vmov 0.0  }
   0xb   :  { %v270_v20 = vpack.c.bf16 %v31_v19, %v30_v18  ;;  %v32_v21 = vld [vmem:[%s458_s1 + $0x50] sm:$0xff]  ;;  %v33_v22 = vld [vmem:[%s458_s1 + $0x58] sm:$0xff]  ;;  %v34_v24 = vld [vmem:[%s458_s1 + $0x60] sm:$0xff]  ;;  %254 = vmatprep.mubr.msk.f32.mxu1 %vm325_vm1, %v326_v42  ;;  %vm146_vm2 = vcmask 261120   ;;  %vm220_vm3 = vcmask 9216  }
   0xc   :  { %265 = vmatpush1.bf16.msra.mxu0 %v264_v9  ;;  %292 = vmatpush3.bf16.msra.mxu1 %v291_v16  ;;  %v273_v23 = vpack.c.bf16 %v33_v22, %v32_v21  ;;  %v35_v25 = vld [vmem:[%s458_s1 + $0x68] sm:$0xff]  ;;  %v36_v27 = vld [vmem:[%s458_s1 + $0x70] sm:$0xff]  ;;  %v37_v28 = vld [vmem:[%s458_s1 + $0x78] sm:$0xff] }
   0xd   :  { %266 = vmatprep.subr.bf16.mxu0 %v324_v3  ;;  %293 = vmatprep.subr.bf16.mxu1 %v324_v3  ;;  %v276_v26 = vpack.c.bf16 %v35_v25, %v34_v24  ;;  %v279_v29 = vpack.c.bf16 %v37_v28, %v36_v27  ;;  %v38_v30 = vld [vmem:[%s458_s1 + $0x80] sm:$0xff]  ;;  %v39_v31 = vld [vmem:[%s458_s1 + $0x88] sm:$0xff]  ;;  %v40_v33 = vld [vmem:[%s458_s1 + $0x90] sm:$0xff] }
   0xe   :  { %v282_v32 = vpack.c.bf16 %v39_v31, %v38_v30  ;;  %v41_v34 = vld [vmem:[%s458_s1 + $0x98] sm:$0xff]  ;;  %v42_v36 = vld [vmem:[%s458_s1 + $0xa0] sm:$0xff]  ;;  %v43_v37 = vld [vmem:[%s458_s1 + $0xa8] sm:$0xff] }
   0xf   :  { %v285_v35 = vpack.c.bf16 %v41_v34, %v40_v33  ;;  %v288_v38 = vpack.c.bf16 %v43_v37, %v42_v36  ;;  %v137_v39 = vld [vmem:[%s460_s3 + $0x10] sm:$0xff]  ;;  %v138_v40 = vld [vmem:[%s460_s3 + $0x18] sm:$0xff]  ;;  %v236_v43 = vld [vmem:[%s459_s2] ss:$0 sm:$0xff]  ;;  %s327_s3 = smov [#allocation2]  }
  0x10   :  { %268 = vmatpush1.bf16.msra.mxu0 %v267_v17  ;;  %v294_v41 = vpack.c.bf16 %v138_v40, %v137_v39  ;;  %v239_v48 = vld [vmem:[%s461_s4] ss:$0 sm:$0xff]  ;;  %s228_s23 = sshll.u32 %s327_s3, 4  ;;  %s229_s23 = int_to_ptr.vmem [resolvable:$true] %s228_s23 }
  0x11   :  { %269 = vmatprep.subr.bf16.mxu0 %v324_v3  ;;  %s300_s24 = scalar_lea.vmem %s229_s23, 32  ;;  %p305_p1 = scmp.lt.s32.totalorder %s229_s23, %s229_s23 }
  0x12   :  { %295 = vmatpush3.bf16.msra.mxu1 %v294_v41  ;;  %p301_p0 = scmp.ne.s32.totalorder %s229_s23, %s300_s24  ;;  %p306_p2 = scmp.lt.s32.totalorder %s300_s24, %s300_s24 }
  0x14   :  { %271 = vmatpush1.bf16.msra.mxu0 %v270_v20  ;;  %p307_p3 = por %p306_p2, %p305_p1 }
  0x15   :  { %272 = vmatprep.subr.bf16.mxu0 %v324_v3 }
  0x16   :  { %p308_p4 = pnand %p307_p3, %p301_p0 }
  0x18   :  { %274 = vmatpush1.bf16.msra.mxu0 %v273_v23 }
  0x19   :  { %275 = vmatprep.subr.bf16.mxu0 %v324_v3 }
  0x1c   :  { %277 = vmatpush1.bf16.msra.mxu0 %v276_v26 }
  0x1d   :  { %278 = vmatprep.subr.bf16.mxu0 %v324_v3 }
  0x20   :  { %280 = vmatpush1.bf16.msra.mxu0 %v279_v29 }
  0x21   :  { %281 = vmatprep.subr.bf16.mxu0 %v324_v3 }
  0x24   :  { %283 = vmatpush1.bf16.msra.mxu0 %v282_v32 }
  0x25   :  { %284 = vmatprep.subr.bf16.mxu0 %v324_v3 }
  0x28   :  { %286 = vmatpush1.bf16.msra.mxu0 %v285_v35 }
  0x29   :  { %287 = vmatprep.subr.bf16.mxu0 %v324_v3 }
  0x2c   :  { %289 = vmatpush1.bf16.msra.mxu0 %v288_v38 }
  0x2f   :  { %129 = vmatmul.mubr.f32.vlgmr.msra.gmra.mrb[0].mxu0 %v237_v11 }
 0x102   :  { %v130_v44 = vpop.f32.mrb[0].mxu0 }
 0x103   :  { %v131_v45 = vadd.f32 %v236_v43, %v130_v44  ;;  %v132_v46 = vpop.f32.mrb[1].mxu0 }
 0x105   :  { %v134_v47 = vmax.f32 %v131_v45, 0.0 }
 0x107   :  { %255 = vmatmul.mubr.msk.f32.vlgmr.msra.gmra.mrb[0].mxu1 %vm146_vm2, %v134_v47 }
 0x1da   :  { %v216_v49 = vpop.f32.mrb[0].mxu1 }
 0x1db   :  { %v217_v50 = vadd.f32 %v239_v48, %v216_v49  ;;  %v256_v51 = vpop.f32.mrb[1].mxu1 }
 0x1dd   :  { %221 = vst.msk [vmem:[#allocation2] sm:$0x3] %vm220_vm3, %v217_v50 }
 0x1de   :  { %311 = shalt.err (!%p308_p4)
}
 0x1df   :  { %s312_s26 = scalar_lea.hbm %s462_s5, 32 }
 0x1e0   :  { %p313_p5 = scmp.ne.s32.totalorder %s462_s5, %s312_s26  ;;  %p316_p6 = scmp.lt.u32.totalorder %s312_s26, %s462_s5 }
 0x1e2   :  { %p318_p7 = pnand %p316_p6, %p313_p5 }
 0x1e4   :  { %321 = shalt.err (!%p318_p7)
}
 0x1e5   :  { %231 = dma.vmem_to_hbm [thread:$0]  %s229_s23, 32, %s462_s5, [#allocation3]  }
 0x1e6   :  { %322 = dma.done.wait [#allocation3], 32  }
 0x1e7   :  { %323 = vsyncadd [#allocation3], 4294967264 }
 0x1e8   :  { %235 = vsyncpa [#allocation3], 1 }

</bundles_post_ra>
